<compile_context>
chip_gen: v7x
topology: tpu7x:2x2x1
jax: 0.10.0
libtpu: 0.0.40
codegen_flags: <defaults>
</compile_context>

<pallas_src>
import functools

import jax
import jax.numpy as jnp
import numpy as np
from jax import lax
from jax.experimental import pallas as pl
from jax.experimental.pallas import tpu as pltpu


def _masked_slab(feat_ref, rem, tk):
    """Load the current (N, tk) feature slab; zero the tail columns of the last
    (partial) K block so out-of-bounds garbage never reaches the MXU."""
    f = feat_ref[...]
    if rem:  # static: only emitted when c*d is not a multiple of tk
        is_last = pl.program_id(0) == pl.num_programs(0) - 1
        limit = jnp.where(is_last, rem, tk)
        col = lax.broadcasted_iota(jnp.int32, f.shape, 1)
        f = jnp.where(col < limit, f, 0).astype(f.dtype)
    return f


def _gram_kernel(scalar_ref, feat_ref, g_ref, *, rem, tk):
    """Accumulate F_slab @ F_slab^T into the resident (N, N) output block;
    scale by 1/(a*b*c*d) on the final reduction step."""
    k = pl.program_id(0)
    f = _masked_slab(feat_ref, rem, tk)
    partial = lax.dot_general(
        f, f, dimension_numbers=(((1,), (1,)), ((), ())),
        preferred_element_type=jnp.float32)

    @pl.when(k == 0)
    def _():
        g_ref[...] = partial

    @pl.when(k > 0)
    def _():
        g_ref[...] += partial

    @pl.when(k == pl.num_programs(0) - 1)
    def _():
        g_ref[...] = g_ref[...] * scalar_ref[0]


def _loss_kernel(scalar_ref, feat_ref, target_ref, loss_ref, acc_ref, *, rem, tk):
    """Accumulate the gram in VMEM scratch (never written to HBM) and emit only
    the scalar  mse_loss(G, target) * weight  through SMEM on the last step."""
    k = pl.program_id(0)
    f = _masked_slab(feat_ref, rem, tk)
    partial = lax.dot_general(
        f, f, dimension_numbers=(((1,), (1,)), ((), ())),
        preferred_element_type=jnp.float32)

    @pl.when(k == 0)
    def _():
        acc_ref[...] = partial

    @pl.when(k > 0)
    def _():
        acc_ref[...] += partial

    @pl.when(k == pl.num_programs(0) - 1)
    def _():
        inv_norm = scalar_ref[0]
        weight = scalar_ref[1]
        diff = acc_ref[...] * inv_norm - target_ref[...]
        loss_ref[0, 0] = jnp.mean(diff * diff) * weight


def _pick_tile_k(n_rows, m, itemsize):
    """K tile: full extent if the double-buffered (N, tk) slab fits the budget,
    else the largest 128-multiple <= 2048 (preferring exact divisors of m)."""
    budget = 16 * 1024 * 1024                       # bytes for 2 x (N, tk) slabs
    by_budget = (budget // (2 * n_rows * itemsize)) // 128 * 128
    cap = int(min(2048, max(128, by_budget)))
    if m <= cap:
        return m                                    # single full-extent block, exact
    for t in range(cap, 511, -128):                 # exact divisor -> no tail mask
        if m % t == 0:
            return t
    return cap                                      # masked tail on the last block


def _vmem_limit(byte_estimate):
    return int(min(max(32 * 1024 * 1024, byte_estimate + 8 * 1024 * 1024),
                   48 * 1024 * 1024))


def gram_matrix(x, *, tile_k=None):
    """Pallas equivalent of the PyTorch gram_matrix: f32 (a*b, a*b) result."""
    a, b, c, d = x.shape
    n, m = a * b, c * d
    feats = x.reshape(n, m)                         # native dtype HBM stream
    itemsize = feats.dtype.itemsize
    tk = tile_k if tile_k is not None else _pick_tile_k(n, m, itemsize)
    num_k = pl.cdiv(m, tk)
    rem = m % tk
    scalars = jnp.array([1.0 / (a * b * c * d)], dtype=jnp.float32)
    vmem_est = 2 * n * tk * itemsize + 2 * n * n * 4 + (1 << 20)

    return pl.pallas_call(
        functools.partial(_gram_kernel, rem=rem, tk=tk),
        out_shape=jax.ShapeDtypeStruct((n, n), jnp.float32),
        grid_spec=pltpu.PrefetchScalarGridSpec(
            num_scalar_prefetch=0,
            grid=(num_k,),
            in_specs=[
                pl.BlockSpec(memory_space=pltpu.MemorySpace.SMEM),  # [1/norm]
                pl.BlockSpec((n, tk), lambda k: (0, k)),            # F K-slab
            ],
            out_specs=pl.BlockSpec((n, n), lambda k: (0, 0)),       # resident gram
        ),
        compiler_params=pltpu.CompilerParams(
            dimension_semantics=("arbitrary",),                     # K reduction
            vmem_limit_bytes=_vmem_limit(vmem_est),
        ),
    )(scalars, feats)


def style_loss(x, target_g, weight, *, tile_k=None):
    """mse_loss(gram_matrix(x), target_g) * weight — gram never leaves VMEM."""
    a, b, c, d = x.shape
    n, m = a * b, c * d
    feats = x.reshape(n, m)
    itemsize = feats.dtype.itemsize
    tk = tile_k if tile_k is not None else _pick_tile_k(n, m, itemsize)
    num_k = pl.cdiv(m, tk)
    rem = m % tk
    scalars = jnp.array([1.0 / (a * b * c * d), float(weight)], dtype=jnp.float32)
    vmem_est = 2 * n * tk * itemsize + 3 * n * n * 4 + (1 << 20)

    loss = pl.pallas_call(
        functools.partial(_loss_kernel, rem=rem, tk=tk),
        out_shape=jax.ShapeDtypeStruct((1, 1), jnp.float32),
        grid_spec=pltpu.PrefetchScalarGridSpec(
            num_scalar_prefetch=0,
            grid=(num_k,),
            in_specs=[
                pl.BlockSpec(memory_space=pltpu.MemorySpace.SMEM),  # [1/norm, w]
                pl.BlockSpec((n, tk), lambda k: (0, k)),            # F K-slab
                pl.BlockSpec((n, n), lambda k: (0, 0)),             # target gram
            ],
            out_specs=pl.BlockSpec(memory_space=pltpu.MemorySpace.SMEM),
            scratch_shapes=[pltpu.VMEM((n, n), jnp.float32)],       # gram accumulator
        ),
        compiler_params=pltpu.CompilerParams(
            dimension_semantics=("arbitrary",),
            vmem_limit_bytes=_vmem_limit(vmem_est),
        ),
    )(scalars, feats, target_g.astype(jnp.float32))
    return loss[0, 0]


class StyleLoss:
    """JAX/Pallas equivalent of the PyTorch StyleLoss module (forward pass)."""

    def __init__(self, target_feature, weight):
        self.target = gram_matrix(target_feature)   # detached by construction
        self.weight = float(weight)
        self.loss = None

    def __call__(self, x):
        self.loss = style_loss(x, self.target, self.weight)
        return x                                    # pass-through, like PyTorch


def _gram_ref(x):
    a, b, c, d = x.shape
    f = x.reshape(a * b, c * d).astype(jnp.float32)
    return (f @ f.T) / (a * b * c * d)


if __name__ == "__main__":
    key = jax.random.PRNGKey(0)
    k1, k2, k3 = jax.random.split(key, 3)

    # Small NCHW conv-feature-like shapes.
    target_feature = jax.random.normal(k1, (2, 4, 16, 16), dtype=jnp.float32)
    x = jax.random.normal(k2, (2, 4, 16, 16), dtype=jnp.float32)
    weight = 1000.0

    module = StyleLoss(target_feature, weight)
    out = jax.block_until_ready(module(x))
    loss = jax.block_until_ready(module.loss)

    # Pure-JAX reference check.
    g_ref_t = _gram_ref(target_feature)
    g_ref_x = _gram_ref(x)
    loss_ref = jnp.mean((g_ref_x - g_ref_t) ** 2) * weight
    np.testing.assert_allclose(np.asarray(out), np.asarray(x), rtol=0, atol=0)
    np.testing.assert_allclose(np.asarray(module.target), np.asarray(g_ref_t),
                               rtol=1e-4, atol=1e-5)
    np.testing.assert_allclose(np.asarray(loss), np.asarray(loss_ref),
                               rtol=1e-5, atol=1e-5)

    # Exercise non-128-multiple contraction (c*d = 14*14 = 196): full-extent K
    # block in gram_matrix, and the masked-tail path with a forced tile_k=128
    # (last slab has rem = 68 valid columns).
    y = jax.random.normal(k3, (2, 4, 14, 14), dtype=jnp.float32)
    g_full = jax.block_until_ready(gram_matrix(y))
    l_masked = jax.block_until_ready(
        style_loss(y, jnp.zeros_like(g_full), 2.0, tile_k=128))
    g_ref_y = _gram_ref(y)
    np.testing.assert_allclose(np.asarray(g_full), np.asarray(g_ref_y),
                               rtol=1e-4, atol=1e-5)
    np.testing.assert_allclose(np.asarray(l_masked),
                               np.asarray(jnp.mean(g_ref_y ** 2) * 2.0),
                               rtol=1e-4, atol=1e-5)

    print("KERNEL_OK")
</pallas_src>

<mosaic_0001>
module attributes {stable_mosaic.version = 11 : i64} {
  func.func @_gram_kernel(%arg0: i32, %arg1: memref<1xf32, #tpu.memory_space<smem>>, %arg2: memref<8x256xf32, #tpu.memory_space<vmem>>, %arg3: memref<8x8xf32, #tpu.memory_space<vmem>>) attributes {dimension_semantics = [#tpu.dimension_semantics<arbitrary>], iteration_bounds = array<i64: 1>, scalar_prefetch = 0 : i64, scratch_operands = 0 : i64, tpu.core_type = #tpu.core_type<tc>, window_params = [{transform_indices = @transform_0, window_bounds = array<i64: 1>}, {transform_indices = @transform_1, window_bounds = array<i64: 8, 256>}, {pipeline_mode = #tpu.pipeline_mode<synchronous>, transform_indices = @transform_2, window_bounds = array<i64: 8, 8>}]} {
    %c0 = arith.constant 0 : index
    %c0_0 = arith.constant 0 : index
    %0 = vector.load %arg2[%c0, %c0_0] : memref<8x256xf32, #tpu.memory_space<vmem>>, vector<8x256xf32>
    %cst = arith.constant dense<0.000000e+00> : vector<8x8xf32>
    %1 = tpu.matmul %0, %0, %cst {dimension_numbers = #tpu.dot_dimension_numbers<[1], [1], [0], [0], [0, 0, 1, 0], [], []>} : vector<8x256xf32>, vector<8x256xf32>, vector<8x8xf32> -> vector<8x8xf32>
    %c0_i32 = arith.constant 0 : i32
    %2 = arith.cmpi eq, %arg0, %c0_i32 : i32
    %3 = arith.extui %2 : i1 to i32
    %c0_i32_1 = arith.constant 0 : i32
    %4 = arith.cmpi ne, %3, %c0_i32_1 : i32
    scf.if %4 {
      %c0_6 = arith.constant 0 : index
      %c0_7 = arith.constant 0 : index
      %11 = vector.load %arg3[%c0_6, %c0_7] : memref<8x8xf32, #tpu.memory_space<vmem>>, vector<8x8xf32>
      tpu.vector_store %arg3[%c0_6, %c0_7], %1 {strides = array<i32>} : memref<8x8xf32, #tpu.memory_space<vmem>>, vector<8x8xf32>,
    } else {
    }
    %c0_i32_2 = arith.constant 0 : i32
    %5 = arith.cmpi sgt, %arg0, %c0_i32_2 : i32
    %6 = arith.extui %5 : i1 to i32
    %c0_i32_3 = arith.constant 0 : i32
    %7 = arith.cmpi ne, %6, %c0_i32_3 : i32
    scf.if %7 {
      %c0_6 = arith.constant 0 : index
      %c0_7 = arith.constant 0 : index
      %11 = vector.load %arg3[%c0_6, %c0_7] : memref<8x8xf32, #tpu.memory_space<vmem>>, vector<8x8xf32>
      %12 = arith.addf %11, %1 : vector<8x8xf32>
      %c0_8 = arith.constant 0 : index
      %c0_9 = arith.constant 0 : index
      %13 = vector.load %arg3[%c0_8, %c0_9] : memref<8x8xf32, #tpu.memory_space<vmem>>, vector<8x8xf32>
      tpu.vector_store %arg3[%c0_8, %c0_9], %12 {strides = array<i32>} : memref<8x8xf32, #tpu.memory_space<vmem>>, vector<8x8xf32>,
    } else {
    }
    %c0_i32_4 = arith.constant 0 : i32
    %8 = arith.cmpi eq, %arg0, %c0_i32_4 : i32
    %9 = arith.extui %8 : i1 to i32
    %c0_i32_5 = arith.constant 0 : i32
    %10 = arith.cmpi ne, %9, %c0_i32_5 : i32
    scf.if %10 {
      %c0_6 = arith.constant 0 : index
      %c0_7 = arith.constant 0 : index
      %11 = vector.load %arg3[%c0_6, %c0_7] : memref<8x8xf32, #tpu.memory_space<vmem>>, vector<8x8xf32>
      %c0_8 = arith.constant 0 : index
      %12 = memref.load %arg1[%c0_8] : memref<1xf32, #tpu.memory_space<smem>>
      %13 = vector.broadcast %12 : f32 to vector<8x8xf32>
      %14 = arith.mulf %11, %13 : vector<8x8xf32>
      %c0_9 = arith.constant 0 : index
      %c0_10 = arith.constant 0 : index
      %15 = vector.load %arg3[%c0_9, %c0_10] : memref<8x8xf32, #tpu.memory_space<vmem>>, vector<8x8xf32>
      tpu.vector_store %arg3[%c0_9, %c0_10], %14 {strides = array<i32>} : memref<8x8xf32, #tpu.memory_space<vmem>>, vector<8x8xf32>,
    } else {
    }
    return
  }
  func.func @transform_0(%arg0: i32) -> i32 {
    %c0_i32 = arith.constant 0 : i32
    %c0_i32_0 = arith.constant 0 : i32
    return %c0_i32 : i32
  }
  func.func @transform_1(%arg0: i32) -> (i32, i32) {
    %c0_i32 = arith.constant 0 : i32
    %c0_i32_0 = arith.constant 0 : i32
    return %c0_i32, %arg0 : i32, i32
  }
  func.func @transform_2(%arg0: i32) -> (i32, i32) {
    %c0_i32 = arith.constant 0 : i32
    %c0_i32_0 = arith.constant 0 : i32
    %c0_i32_1 = arith.constant 0 : i32
    return %c0_i32, %c0_i32_0 : i32, i32
  }
}

</mosaic_0001>

<bundles_post_ra>
// kernel: tpu_custom_call.1
= control target key start
LH: loop header
LB: loop body
LE: loop exit
PB: predicated region body
PF: predicated region fallthrough
CT: control target
= control target key end

     0   :  { %8 = vsyncpa [#allocation4], 0  ;;  %s229_s0 = inlined_call_operand.<no memory space> [shape: f32[1], index: 0, kind: input, shape index: {}]   ;;  %s230_s1 = inlined_call_operand.hbm [shape: f32[8,256], index: 1, kind: input, shape index: {}]   ;;  %s231_s2 = inlined_call_operand.hbm [shape: f32[8,8], index: 2, kind: output, shape index: {}]  }
   0x1   :  { %9 = vsyncpa [#allocation5], 0  ;;  %s185_s9 = smov [#allocation3]   ;;  %s137_s13 = scalar_lea.hbm %s230_s1, 256 }
   0x2   :  { %s18_s10 = sshll.u32 %s185_s9, 4  ;;  %p138_p0 = scmp.ne.s32.totalorder %s230_s1, %s137_s13  ;;  %s19_s10 = int_to_ptr.vmem [resolvable:$true] %s18_s10 }
   0x3   :  { %p141_p1 = scmp.lt.u32.totalorder %s137_s13, %s230_s1 }
   0x5   :  { %p143_p2 = pnand %p141_p1, %p138_p0 }
   0x7   :  { %146 = shalt.err (!%p143_p2)
}
   0x8   :  { %s147_s18 = scalar_lea.vmem %s19_s10, 256  ;;  %p152_p4 = scmp.lt.s32.totalorder %s19_s10, %s19_s10 }
   0x9   :  { %p148_p3 = scmp.ne.s32.totalorder %s19_s10, %s147_s18  ;;  %p153_p5 = scmp.lt.s32.totalorder %s147_s18, %s147_s18 }
   0xb   :  { %p154_p6 = por %p153_p5, %p152_p4 }
   0xd   :  { %p155_p7 = pnand %p154_p6, %p148_p3 }
   0xf   :  { %158 = shalt.err (!%p155_p7)
}
  0x10   :  { %21 = dma.hbm_to_vmem [thread:$0]  %s230_s1, 256, %s19_s10, [#allocation4]  }
  0x11   :  { %181 = dma.done.wait [#allocation4], 256  }
  0x12   :  { %182 = vsyncadd [#allocation4], 4294967040  ;;  %v26_v0 = vld [vmem:[#allocation3 + $0x8] sm:$0xff]  ;;  %v25_v1 = vld [vmem:[#allocation3] sm:$0xff]  ;;  %vm101_vm0 = vcmask 64512   ;;  %v116_v4 = vstv %s229_s0  ;;  %s186_s23 = smov [#allocation6]  }
  0x13   :  { %27 = vmatprep.subr.mxu0 %v26_v0  ;;  %91 = vmatprep.mubr.f32.mxu0 %v26_v0  ;;  %s126_s24 = sshll.u32 %s186_s23, 4  ;;  %s127_s24 = int_to_ptr.vmem [resolvable:$true] %s126_s24 }
  0x14   :  { %28 = vmatpush1.xpose.msra.mxu0 %v25_v1  ;;  %s159_s1 = scalar_lea.vmem %s127_s24, 128  ;;  %p164_p9 = scmp.lt.s32.totalorder %s127_s24, %s127_s24 }
  0x15   :  { %p160_p8 = scmp.ne.s32.totalorder %s127_s24, %s159_s1  ;;  %p165_p10 = scmp.lt.s32.totalorder %s159_s1, %s159_s1 }
  0x17   :  { %92 = vmatmul.mubr.f32.vlgmr.msra.gmra.mrb[0].mxu0 %v25_v1  ;;  %p166_p11 = por %p165_p10, %p164_p9 }
  0x19   :  { %p167_p12 = pnand %p166_p11, %p160_p8 }
  0xea   :  { %v93_v2 = vpop.f32.mrb[0].mxu0 }
  0xeb   :  { %102 = vst.msk [vmem:[#allocation6] sm:$0xff] %vm101_vm0, %v93_v2  ;;  %v95_v3 = vpop.f32.mrb[1].mxu0 }
  0xf2   :  { %v114_v5 = vld [vmem:[#allocation6] sm:$0xff] }
  0xf3   :  { %v117_v6 = vmul.f32 %v116_v4, %v114_v5 }
  0xf5   :  { %119 = vst.msk [vmem:[#allocation6] sm:$0xff] %vm101_vm0, %v117_v6 }
  0xf6   :  { %170 = shalt.err (!%p167_p12)
}
  0xf7   :  { %s171_s27 = scalar_lea.hbm %s231_s2, 128 }
  0xf8   :  { %p172_p13 = scmp.ne.s32.totalorder %s231_s2, %s171_s27  ;;  %p175_p0 = scmp.lt.u32.totalorder %s171_s27, %s231_s2 }
  0xfa   :  { %p177_p1 = pnand %p175_p0, %p172_p13 }
  0xfc   :  { %180 = shalt.err (!%p177_p1)
}
  0xfd   :  { %129 = dma.vmem_to_hbm [thread:$0]  %s127_s24, 128, %s231_s2, [#allocation5]  }
  0xfe   :  { %183 = dma.done.wait [#allocation5], 128  }
  0xff   :  { %184 = vsyncadd [#allocation5], 4294967168 }
 0x100   :  { %133 = vsyncpa [#allocation4], 1 }
 0x101   :  { %134 = vsyncpa [#allocation5], 1 }

</bundles_post_ra>
